<compile_context>
chip_gen: v5e
topology: v5e:2x2
jax: 0.10.0
libtpu: 0.0.40
codegen_flags: <defaults>
</compile_context>

<pallas_src>
import math
from functools import partial

import jax
import jax.numpy as jnp
from jax.experimental import pallas as pl
from jax.experimental.pallas import tpu as pltpu


def _range_bn_kernel(gamma_ref, beta_ref, x_ref, o_ref, *, cs, scale_fix, eps):
    """Range batch-norm over a block of cb channels.

    Block layout (B, cb, R, L):
      * axis 1 = channels (cb per grid step),
      * (R, L) is a lane-dense factorization of the per-image spatial extent,
      * per channel, the flat (B*R*L) stream in (b, r, l) order equals the
        torch flatten order; chunks are contiguous runs of `cs` elements and
        (wrapper-guaranteed) each chunk is a rectangle in (b, r, l): a lane
        segment, a group of whole rows, or a group of whole images.
    gamma_ref / beta_ref: (1, cb, 1, 1) f32 blocks (broadcast-ready shape).
    """
    xb = x_ref[...]                                   # (B, cb, R, L), input dtype
    B, cb, R, L = xb.shape
    hw = R * L
    n_chunks = (B * hw) // cs                         # == num_chunks (small)

    # --- per-chunk max / min (static unrolled loop over num_chunks chunks) ---
    sum_max = None
    sum_min = None
    for j in range(n_chunks):
        start = j * cs
        b0 = start // hw
        r0 = (start % hw) // L
        if cs <= L:                      # chunk = one lane segment of one row
            l0 = start % L
            seg = xb[b0:b0 + 1, :, r0:r0 + 1, l0:l0 + cs]            # (1,cb,1,cs)
            cmx = jnp.max(seg, axis=-1, keepdims=True)
            cmn = jnp.min(seg, axis=-1, keepdims=True)
        elif cs <= hw:                   # chunk = cs//L whole rows of one image
            dr = cs // L
            seg = xb[b0:b0 + 1, :, r0:r0 + dr, :]                    # (1,cb,dr,L)
            cmx = jnp.max(jnp.max(seg, axis=-1, keepdims=True), axis=2, keepdims=True)
            cmn = jnp.min(jnp.min(seg, axis=-1, keepdims=True), axis=2, keepdims=True)
        else:                            # chunk = cs//hw whole images
            db = cs // hw
            seg = xb[b0:b0 + db]                                     # (db,cb,R,L)
            cmx = jnp.max(jnp.max(seg, axis=-1, keepdims=True), axis=2, keepdims=True)
            cmx = jnp.max(cmx, axis=0, keepdims=True)
            cmn = jnp.min(jnp.min(seg, axis=-1, keepdims=True), axis=2, keepdims=True)
            cmn = jnp.min(cmn, axis=0, keepdims=True)
        cmx = cmx.astype(jnp.float32)                                # (1,cb,1,1)
        cmn = cmn.astype(jnp.float32)
        sum_max = cmx if sum_max is None else sum_max + cmx
        sum_min = cmn if sum_min is None else sum_min + cmn
    inv_nc = 1.0 / n_chunks
    avg_max = sum_max * inv_nc                                       # (1,cb,1,1)
    avg_min = sum_min * inv_nc

    # --- per-channel mean over all B*H*W elements (cast folded into reduce) ---
    s = jnp.sum(xb.astype(jnp.float32), axis=-1, keepdims=True)      # (B,cb,R,1)
    s = jnp.sum(s, axis=2, keepdims=True)                            # (B,cb,1,1)
    s = jnp.sum(s, axis=0, keepdims=True)                            # (1,cb,1,1)
    avg = s * (1.0 / (B * hw))

    scale = 1.0 / ((avg_max - avg_min) * scale_fix + eps)

    # Fold per-channel scalars -> one fused multiply-add per element.
    m = scale * gamma_ref[...]                                       # (1,cb,1,1)
    b = beta_ref[...] - avg * m
    # Apply as a separate read of x_ref: no full-block f32 temp kept live.
    o_ref[...] = (x_ref[...].astype(jnp.float32) * m + b).astype(o_ref.dtype)


def _ceil_to(v, m):
    return -(-v // m) * m


def _pick_rows_lanes(hw, cs):
    """Factor hw == R * L so each chunk of `cs` contiguous per-channel elements
    is a rectangle in (image, row, lane).  Prefer a lane-dense L (multiple of
    128 -> unmasked vst), then minimal padded-vreg footprint, then wider L.
    Returns None if no chunk-compatible factorization exists."""
    best_key, best = None, None
    for L in range(1, hw + 1):
        if hw % L:
            continue
        compatible = (L % cs == 0) or (cs % L == 0 and (hw % cs == 0 or cs % hw == 0))
        if not compatible:
            continue
        R = hw // L
        key = (0 if L % 128 == 0 else 1,
               (_ceil_to(R, 8) // 8) * (_ceil_to(L, 128) // 128),
               -L)
        if best_key is None or key < best_key:
            best_key, best = key, (R, L)
    return best


def _vmem_limit_bytes():
    """Generation-aware VMEM limit: ~3/4 of physical, capped at 96 MiB
    (128 MiB parts -> 96 MiB; v7x 64 MiB -> 48 MiB)."""
    cap = 64 << 20                         # conservative fallback (v7x-sized)
    try:
        cap = int(pltpu.get_tpu_info().vmem_capacity_bytes)
    except Exception:
        pass
    return min((cap * 3) // 4, 96 << 20)


def _pick_channel_block(C, padded_bytes_per_channel, budget_bytes):
    """Largest divisor of C under the VMEM budget, capped at C//2 so the
    'parallel' grid axis has >=2 steps (keeps both v7x TensorCores busy)."""
    max_cb = max(1, C // 2)
    best = 1
    for d in range(1, max_cb + 1):
        if C % d == 0 and d * padded_bytes_per_channel <= budget_bytes:
            best = d
    return best


def _run_range_bn(x4, gamma, beta, *, cs, scale_fix, eps):
    B4, C, R, L = x4.shape
    vmem_limit = _vmem_limit_bytes()
    # Effective use ~ 2 buffers x (in + out) x block + in-flight f32 temps ~ 5x.
    padded_bpc = B4 * _ceil_to(R, 8) * _ceil_to(L, 128) * 4
    cb = _pick_channel_block(C, padded_bpc, vmem_limit // 5)
    # TODO(synk): stats-pass + apply-pass split needed when padded_bpc alone
    #   exceeds the budget (huge per-channel footprints).

    gamma4 = gamma.reshape(1, C, 1, 1).astype(jnp.float32)
    beta4 = beta.reshape(1, C, 1, 1).astype(jnp.float32)

    kernel = partial(_range_bn_kernel, cs=cs, scale_fix=scale_fix, eps=float(eps))

    nbytes = x4.size * x4.dtype.itemsize
    try:
        cost = pl.CostEstimate(flops=int(6 * x4.size), transcendentals=0,
                               bytes_accessed=int(2 * nbytes + 8 * C))
    except Exception:
        cost = None

    return pl.pallas_call(
        kernel,
        out_shape=jax.ShapeDtypeStruct(x4.shape, x4.dtype),
        grid_spec=pltpu.PrefetchScalarGridSpec(
            num_scalar_prefetch=0,
            grid=(C // cb,),
            in_specs=[
                pl.BlockSpec((1, cb, 1, 1), lambda i: (0, i, 0, 0)),     # gamma
                pl.BlockSpec((1, cb, 1, 1), lambda i: (0, i, 0, 0)),     # beta
                pl.BlockSpec((B4, cb, R, L), lambda i: (0, i, 0, 0)),    # x
            ],
            out_specs=pl.BlockSpec((B4, cb, R, L), lambda i: (0, i, 0, 0)),
        ),
        compiler_params=pltpu.CompilerParams(
            dimension_semantics=("parallel",),
            vmem_limit_bytes=vmem_limit,
        ),
        cost_estimate=cost,
    )(gamma4, beta4, x4)


def bfp_range_batchnorm2d(x, gamma, beta, *, num_chunks=8, eps=1e-5):
    """x: (B, C, H, W), gamma/beta: (C,).  Returns array of x.dtype."""
    B, C, H, W = x.shape
    hw = H * W
    total = B * hw
    assert total % num_chunks == 0, "B*H*W must be divisible by num_chunks"
    cs = total // num_chunks
    scale_fix = 1.0 / math.sqrt(2.0 * math.log(cs))

    rl = _pick_rows_lanes(hw, cs)
    if rl is not None:
        # Fast path (covers cs | H*W and H*W | cs): free reshape of NCHW to
        # (B, C, R, L); BlockSpec gathers whole channels -> minimal 2x HBM.
        R, L = rl
        x4 = x.reshape(B, C, R, L)
        out4 = _run_range_bn(x4, gamma, beta, cs=cs, scale_fix=scale_fix, eps=eps)
        return out4.reshape(B, C, H, W)

    # TODO(synk): rare incompatible chunking (cs neither divides nor is a
    #   multiple of H*W) still uses a channel-major XLA transpose (~3x HBM).
    rl = _pick_rows_lanes(total, cs) or (total // cs, cs)
    R, L = rl
    xt = jnp.transpose(x, (1, 0, 2, 3)).reshape(1, C, R, L)
    out = _run_range_bn(xt, gamma, beta, cs=cs, scale_fix=scale_fix, eps=eps)
    return jnp.transpose(out.reshape(C, B, H, W), (1, 0, 2, 3))


def _reference(x, gamma, beta, *, num_chunks=8, eps=1e-5):
    """Pure-JAX reference mirroring the PyTorch forward."""
    B, C, H, W = x.shape
    y = jnp.transpose(x, (1, 0, 2, 3)).reshape(C, num_chunks, -1)
    avg_max = jnp.mean(jnp.max(y, axis=-1), axis=-1)
    avg_min = jnp.mean(jnp.min(y, axis=-1), axis=-1)
    avg = jnp.mean(y.reshape(C, -1), axis=-1)
    scale_fix = 1.0 / math.sqrt(2.0 * math.log(y.shape[-1]))
    scale = 1.0 / ((avg_max - avg_min) * scale_fix + eps)
    out = (x - avg.reshape(1, C, 1, 1)) * scale.reshape(1, C, 1, 1)
    return out * gamma.reshape(1, C, 1, 1) + beta.reshape(1, C, 1, 1)


if __name__ == "__main__":
    B, C, H, W = 2, 4, 16, 16
    num_chunks = 8
    eps = 1e-5

    key = jax.random.PRNGKey(0)
    kx, kg = jax.random.split(key)
    x = jax.random.normal(kx, (B, C, H, W), dtype=jnp.float32)

    # Deterministic "parameters": gamma ~ U[0,1) (like .uniform_()), beta = 0
    gamma = jax.random.uniform(kg, (C,), dtype=jnp.float32)
    beta = jnp.zeros((C,), dtype=jnp.float32)

    out = bfp_range_batchnorm2d(x, gamma, beta, num_chunks=num_chunks, eps=eps)
    out = jax.block_until_ready(out)

    ref = _reference(x, gamma, beta, num_chunks=num_chunks, eps=eps)
    assert out.shape == (B, C, H, W)
    assert jnp.allclose(out, ref, atol=1e-5, rtol=1e-5), "mismatch vs reference"

    print("KERNEL_OK")
</pallas_src>

<mosaic_0001>
module attributes {stable_mosaic.version = 11 : i64} {
  func.func @_range_bn_kernel(%arg0: i32, %arg1: memref<1x2x1x1xf32, #tpu.memory_space<vmem>>, %arg2: memref<1x2x1x1xf32, #tpu.memory_space<vmem>>, %arg3: memref<2x2x2x128xf32, #tpu.memory_space<vmem>>, %arg4: memref<2x2x2x128xf32, #tpu.memory_space<vmem>>) attributes {dimension_semantics = [#tpu.dimension_semantics<parallel>], iteration_bounds = array<i64: 2>, scalar_prefetch = 0 : i64, scratch_operands = 0 : i64, tpu.core_type = #tpu.core_type<tc>, window_params = [{transform_indices = @transform_0, window_bounds = array<i64: 1, 2, 1, 1>}, {transform_indices = @transform_1, window_bounds = array<i64: 1, 2, 1, 1>}, {transform_indices = @transform_2, window_bounds = array<i64: 2, 2, 2, 128>}, {transform_indices = @transform_3, window_bounds = array<i64: 2, 2, 2, 128>}]} {
    %c0 = arith.constant 0 : index
    %c0_0 = arith.constant 0 : index
    %c0_1 = arith.constant 0 : index
    %c0_2 = arith.constant 0 : index
    %0 = vector.load %arg3[%c0, %c0_0, %c0_1, %c0_2] : memref<2x2x2x128xf32, #tpu.memory_space<vmem>>, vector<2x2x2x128xf32>
    %1 = vector.extract_strided_slice %0 {offsets = [0, 0, 0, 0], sizes = [1, 2, 1, 64], strides = [1, 1, 1, 1]} : vector<2x2x2x128xf32> to vector<1x2x1x64xf32>
    %cst = arith.constant dense<0xFF800000> : vector<1x2x1xf32>
    %2 = vector.multi_reduction <maximumf>, %1, %cst [3] : vector<1x2x1x64xf32> to vector<1x2x1xf32>
    %3 = vector.shape_cast %2 : vector<1x2x1xf32> to vector<1x2x1x1xf32>
    %cst_3 = arith.constant dense<0x7F800000> : vector<1x2x1xf32>
    %4 = vector.multi_reduction <minimumf>, %1, %cst_3 [3] : vector<1x2x1x64xf32> to vector<1x2x1xf32>
    %5 = vector.shape_cast %4 : vector<1x2x1xf32> to vector<1x2x1x1xf32>
    %6 = vector.extract_strided_slice %0 {offsets = [0, 0, 0, 64], sizes = [1, 2, 1, 64], strides = [1, 1, 1, 1]} : vector<2x2x2x128xf32> to vector<1x2x1x64xf32>
    %cst_4 = arith.constant dense<0xFF800000> : vector<1x2x1xf32>
    %7 = vector.multi_reduction <maximumf>, %6, %cst_4 [3] : vector<1x2x1x64xf32> to vector<1x2x1xf32>
    %8 = vector.shape_cast %7 : vector<1x2x1xf32> to vector<1x2x1x1xf32>
    %cst_5 = arith.constant dense<0x7F800000> : vector<1x2x1xf32>
    %9 = vector.multi_reduction <minimumf>, %6, %cst_5 [3] : vector<1x2x1x64xf32> to vector<1x2x1xf32>
    %10 = vector.shape_cast %9 : vector<1x2x1xf32> to vector<1x2x1x1xf32>
    %11 = arith.addf %3, %8 : vector<1x2x1x1xf32>
    %12 = arith.addf %5, %10 : vector<1x2x1x1xf32>
    %13 = vector.extract_strided_slice %0 {offsets = [0, 0, 1, 0], sizes = [1, 2, 1, 64], strides = [1, 1, 1, 1]} : vector<2x2x2x128xf32> to vector<1x2x1x64xf32>
    %cst_6 = arith.constant dense<0xFF800000> : vector<1x2x1xf32>
    %14 = vector.multi_reduction <maximumf>, %13, %cst_6 [3] : vector<1x2x1x64xf32> to vector<1x2x1xf32>
    %15 = vector.shape_cast %14 : vector<1x2x1xf32> to vector<1x2x1x1xf32>
    %cst_7 = arith.constant dense<0x7F800000> : vector<1x2x1xf32>
    %16 = vector.multi_reduction <minimumf>, %13, %cst_7 [3] : vector<1x2x1x64xf32> to vector<1x2x1xf32>
    %17 = vector.shape_cast %16 : vector<1x2x1xf32> to vector<1x2x1x1xf32>
    %18 = arith.addf %11, %15 : vector<1x2x1x1xf32>
    %19 = arith.addf %12, %17 : vector<1x2x1x1xf32>
    %20 = vector.extract_strided_slice %0 {offsets = [0, 0, 1, 64], sizes = [1, 2, 1, 64], strides = [1, 1, 1, 1]} : vector<2x2x2x128xf32> to vector<1x2x1x64xf32>
    %cst_8 = arith.constant dense<0xFF800000> : vector<1x2x1xf32>
    %21 = vector.multi_reduction <maximumf>, %20, %cst_8 [3] : vector<1x2x1x64xf32> to vector<1x2x1xf32>
    %22 = vector.shape_cast %21 : vector<1x2x1xf32> to vector<1x2x1x1xf32>
    %cst_9 = arith.constant dense<0x7F800000> : vector<1x2x1xf32>
    %23 = vector.multi_reduction <minimumf>, %20, %cst_9 [3] : vector<1x2x1x64xf32> to vector<1x2x1xf32>
    %24 = vector.shape_cast %23 : vector<1x2x1xf32> to vector<1x2x1x1xf32>
    %25 = arith.addf %18, %22 : vector<1x2x1x1xf32>
    %26 = arith.addf %19, %24 : vector<1x2x1x1xf32>
    %27 = vector.extract_strided_slice %0 {offsets = [1, 0, 0, 0], sizes = [1, 2, 1, 64], strides = [1, 1, 1, 1]} : vector<2x2x2x128xf32> to vector<1x2x1x64xf32>
    %cst_10 = arith.constant dense<0xFF800000> : vector<1x2x1xf32>
    %28 = vector.multi_reduction <maximumf>, %27, %cst_10 [3] : vector<1x2x1x64xf32> to vector<1x2x1xf32>
    %29 = vector.shape_cast %28 : vector<1x2x1xf32> to vector<1x2x1x1xf32>
    %cst_11 = arith.constant dense<0x7F800000> : vector<1x2x1xf32>
    %30 = vector.multi_reduction <minimumf>, %27, %cst_11 [3] : vector<1x2x1x64xf32> to vector<1x2x1xf32>
    %31 = vector.shape_cast %30 : vector<1x2x1xf32> to vector<1x2x1x1xf32>
    %32 = arith.addf %25, %29 : vector<1x2x1x1xf32>
    %33 = arith.addf %26, %31 : vector<1x2x1x1xf32>
    %34 = vector.extract_strided_slice %0 {offsets = [1, 0, 0, 64], sizes = [1, 2, 1, 64], strides = [1, 1, 1, 1]} : vector<2x2x2x128xf32> to vector<1x2x1x64xf32>
    %cst_12 = arith.constant dense<0xFF800000> : vector<1x2x1xf32>
    %35 = vector.multi_reduction <maximumf>, %34, %cst_12 [3] : vector<1x2x1x64xf32> to vector<1x2x1xf32>
    %36 = vector.shape_cast %35 : vector<1x2x1xf32> to vector<1x2x1x1xf32>
    %cst_13 = arith.constant dense<0x7F800000> : vector<1x2x1xf32>
    %37 = vector.multi_reduction <minimumf>, %34, %cst_13 [3] : vector<1x2x1x64xf32> to vector<1x2x1xf32>
    %38 = vector.shape_cast %37 : vector<1x2x1xf32> to vector<1x2x1x1xf32>
    %39 = arith.addf %32, %36 : vector<1x2x1x1xf32>
    %40 = arith.addf %33, %38 : vector<1x2x1x1xf32>
    %41 = vector.extract_strided_slice %0 {offsets = [1, 0, 1, 0], sizes = [1, 2, 1, 64], strides = [1, 1, 1, 1]} : vector<2x2x2x128xf32> to vector<1x2x1x64xf32>
    %cst_14 = arith.constant dense<0xFF800000> : vector<1x2x1xf32>
    %42 = vector.multi_reduction <maximumf>, %41, %cst_14 [3] : vector<1x2x1x64xf32> to vector<1x2x1xf32>
    %43 = vector.shape_cast %42 : vector<1x2x1xf32> to vector<1x2x1x1xf32>
    %cst_15 = arith.constant dense<0x7F800000> : vector<1x2x1xf32>
    %44 = vector.multi_reduction <minimumf>, %41, %cst_15 [3] : vector<1x2x1x64xf32> to vector<1x2x1xf32>
    %45 = vector.shape_cast %44 : vector<1x2x1xf32> to vector<1x2x1x1xf32>
    %46 = arith.addf %39, %43 : vector<1x2x1x1xf32>
    %47 = arith.addf %40, %45 : vector<1x2x1x1xf32>
    %48 = vector.extract_strided_slice %0 {offsets = [1, 0, 1, 64], sizes = [1, 2, 1, 64], strides = [1, 1, 1, 1]} : vector<2x2x2x128xf32> to vector<1x2x1x64xf32>
    %cst_16 = arith.constant dense<0xFF800000> : vector<1x2x1xf32>
    %49 = vector.multi_reduction <maximumf>, %48, %cst_16 [3] : vector<1x2x1x64xf32> to vector<1x2x1xf32>
    %50 = vector.shape_cast %49 : vector<1x2x1xf32> to vector<1x2x1x1xf32>
    %cst_17 = arith.constant dense<0x7F800000> : vector<1x2x1xf32>
    %51 = vector.multi_reduction <minimumf>, %48, %cst_17 [3] : vector<1x2x1x64xf32> to vector<1x2x1xf32>
    %52 = vector.shape_cast %51 : vector<1x2x1xf32> to vector<1x2x1x1xf32>
    %53 = arith.addf %46, %50 : vector<1x2x1x1xf32>
    %54 = arith.addf %47, %52 : vector<1x2x1x1xf32>
    %cst_18 = arith.constant 1.250000e-01 : f32
    %55 = vector.broadcast %cst_18 : f32 to vector<1x2x1x1xf32>
    %56 = arith.mulf %53, %55 : vector<1x2x1x1xf32>
    %cst_19 = arith.constant 1.250000e-01 : f32
    %57 = vector.broadcast %cst_19 : f32 to vector<1x2x1x1xf32>
    %58 = arith.mulf %54, %57 : vector<1x2x1x1xf32>
    %cst_20 = arith.constant dense<0.000000e+00> : vector<2x2x2xf32>
    %59 = vector.multi_reduction <add>, %0, %cst_20 [3] : vector<2x2x2x128xf32> to vector<2x2x2xf32>
    %60 = vector.shape_cast %59 : vector<2x2x2xf32> to vector<2x2x2x1xf32>
    %cst_21 = arith.constant dense<0.000000e+00> : vector<2x2x1xf32>
    %61 = vector.multi_reduction <add>, %60, %cst_21 [2] : vector<2x2x2x1xf32> to vector<2x2x1xf32>
    %62 = vector.shape_cast %61 : vector<2x2x1xf32> to vector<2x2x1x1xf32>
    %cst_22 = arith.constant dense<0.000000e+00> : vector<2x1x1xf32>
    %63 = vector.multi_reduction <add>, %62, %cst_22 [0] : vector<2x2x1x1xf32> to vector<2x1x1xf32>
    %64 = vector.shape_cast %63 : vector<2x1x1xf32> to vector<1x2x1x1xf32>
    %cst_23 = arith.constant 0.001953125 : f32
    %65 = vector.broadcast %cst_23 : f32 to vector<1x2x1x1xf32>
    %66 = arith.mulf %64, %65 : vector<1x2x1x1xf32>
    %67 = arith.subf %56, %58 : vector<1x2x1x1xf32>
    %cst_24 = arith.constant 0.346734166 : f32
    %68 = vector.broadcast %cst_24 : f32 to vector<1x2x1x1xf32>
    %69 = arith.mulf %67, %68 : vector<1x2x1x1xf32>
    %cst_25 = arith.constant 9.99999974E-6 : f32
    %70 = vector.broadcast %cst_25 : f32 to vector<1x2x1x1xf32>
    %71 = arith.addf %69, %70 : vector<1x2x1x1xf32>
    %cst_26 = arith.constant 1.000000e+00 : f32
    %72 = vector.broadcast %cst_26 : f32 to vector<1x2x1x1xf32>
    %73 = arith.divf %72, %71 : vector<1x2x1x1xf32>
    %c0_27 = arith.constant 0 : index
    %c0_28 = arith.constant 0 : index
    %c0_29 = arith.constant 0 : index
    %c0_30 = arith.constant 0 : index
    %74 = vector.load %arg1[%c0_27, %c0_28, %c0_29, %c0_30] : memref<1x2x1x1xf32, #tpu.memory_space<vmem>>, vector<1x2x1x1xf32>
    %75 = arith.mulf %73, %74 : vector<1x2x1x1xf32>
    %c0_31 = arith.constant 0 : index
    %c0_32 = arith.constant 0 : index
    %c0_33 = arith.constant 0 : index
    %c0_34 = arith.constant 0 : index
    %76 = vector.load %arg2[%c0_31, %c0_32, %c0_33, %c0_34] : memref<1x2x1x1xf32, #tpu.memory_space<vmem>>, vector<1x2x1x1xf32>
    %77 = arith.mulf %66, %75 : vector<1x2x1x1xf32>
    %78 = arith.subf %76, %77 : vector<1x2x1x1xf32>
    %c0_35 = arith.constant 0 : index
    %c0_36 = arith.constant 0 : index
    %c0_37 = arith.constant 0 : index
    %c0_38 = arith.constant 0 : index
    %79 = vector.load %arg3[%c0_35, %c0_36, %c0_37, %c0_38] : memref<2x2x2x128xf32, #tpu.memory_space<vmem>>, vector<2x2x2x128xf32>
    %80 = vector.broadcast %75 : vector<1x2x1x1xf32> to vector<2x2x2x128xf32>
    %81 = arith.mulf %79, %80 : vector<2x2x2x128xf32>
    %82 = vector.broadcast %78 : vector<1x2x1x1xf32> to vector<2x2x2x128xf32>
    %83 = arith.addf %81, %82 : vector<2x2x2x128xf32>
    %c0_39 = arith.constant 0 : index
    %c0_40 = arith.constant 0 : index
    %c0_41 = arith.constant 0 : index
    %c0_42 = arith.constant 0 : index
    %84 = vector.load %arg4[%c0_39, %c0_40, %c0_41, %c0_42] : memref<2x2x2x128xf32, #tpu.memory_space<vmem>>, vector<2x2x2x128xf32>
    tpu.vector_store %arg4[%c0_39, %c0_40, %c0_41, %c0_42], %83 {strides = array<i32>} : memref<2x2x2x128xf32, #tpu.memory_space<vmem>>, vector<2x2x2x128xf32>,
    return
  }
  func.func @transform_0(%arg0: i32) -> (i32, i32, i32, i32) {
    %c0_i32 = arith.constant 0 : i32
    %c0_i32_0 = arith.constant 0 : i32
    %c0_i32_1 = arith.constant 0 : i32
    %c0_i32_2 = arith.constant 0 : i32
    return %c0_i32, %arg0, %c0_i32_0, %c0_i32_1 : i32, i32, i32, i32
  }
  func.func @transform_1(%arg0: i32) -> (i32, i32, i32, i32) {
    %c0_i32 = arith.constant 0 : i32
    %c0_i32_0 = arith.constant 0 : i32
    %c0_i32_1 = arith.constant 0 : i32
    %c0_i32_2 = arith.constant 0 : i32
    return %c0_i32, %arg0, %c0_i32_0, %c0_i32_1 : i32, i32, i32, i32
  }
  func.func @transform_2(%arg0: i32) -> (i32, i32, i32, i32) {
    %c0_i32 = arith.constant 0 : i32
    %c0_i32_0 = arith.constant 0 : i32
    %c0_i32_1 = arith.constant 0 : i32
    %c0_i32_2 = arith.constant 0 : i32
    return %c0_i32, %arg0, %c0_i32_0, %c0_i32_1 : i32, i32, i32, i32
  }
  func.func @transform_3(%arg0: i32) -> (i32, i32, i32, i32) {
    %c0_i32 = arith.constant 0 : i32
    %c0_i32_0 = arith.constant 0 : i32
    %c0_i32_1 = arith.constant 0 : i32
    %c0_i32_2 = arith.constant 0 : i32
    return %c0_i32, %arg0, %c0_i32_0, %c0_i32_1 : i32, i32, i32, i32
  }
}

</mosaic_0001>

<bundles_post_ra>
// kernel: tpu_custom_call.1
= control target key start
LH: loop header
LB: loop body
LE: loop exit
PB: predicated region body
PF: predicated region fallthrough
CT: control target
= control target key end

     0   :  { %8 = vsyncpa [#allocation3], 0  ;;  %s1098_s0 = inlined_call_operand.vmem [shape: f32[1,4,1,1], index: 0, kind: input, shape index: {}]   ;;  %s1099_s1 = inlined_call_operand.vmem [shape: f32[1,4,1,1], index: 1, kind: input, shape index: {}]   ;;  %s1100_s2 = inlined_call_operand.hbm [shape: f32[2,4,2,128], index: 2, kind: input, shape index: {}]   ;;  %s1101_s3 = inlined_call_operand.hbm [shape: f32[2,4,2,128], index: 3, kind: output, shape index: {}]  }
   0x1   :  { %10 = vsyncpa [#allocation3 + $0x1], 0 }
   0x2   :  { %11 = vsyncpa [#allocation4], 0 }
   0x3   :  { %13 = vsyncpa [#allocation4 + $0x1], 0  ;;  %s861_s12 = smov 0   ;;  %s863_s13 = smov 0  }
   0x4   :  { %s865_s14 = smov 0   ;;  %s867_s15 = smov 0  }
   0x5 LB: > { %s882_s16 = sadd.s32 4294967295, %s827_s15   ;;  %s693_s17 = sadd.s32 4294967294, %s827_s15   ;;  %s827_s15 = sphi %s867_s15, %s1109_s15   ;;  %s823_s14 = sphi %s865_s14, %s1108_s14   ;;  %s819_s13 = sphi %s863_s13, %s1107_s13   ;;  %s815_s12 = sphi %s861_s12, %s1106_s12  }
   0x6   : > { %s886_s18 = sadd.s32 1, %s827_s15   ;;  %s78_s19 = sadd.s32 1, %s823_s14 }
   0x7   : > { %s75_s20 = ssub.s32 %s827_s15, %s886_s18  ;;  %p85_p0 = scmp.ne.s32.totalorder %s823_s14, %s819_s13 }
   0x8   : > { %p76_p1 = scmp.eq.s32.totalorder %s75_s20, 0  ;;  %p86_p2 = scmp.eq.s32.totalorder %s827_s15, 0 }
   0x9   : > { %p91_p3 = scmp.ne.s32.totalorder %s819_s13, %s815_s12  ;;  %p92_p4 = scmp.eq.s32.totalorder %s882_s16, 0 }
   0xa   : > { %s898_s21 = scalar_select %p76_p1, %s823_s14, %s78_s19  }
   0xb   : > { %p900_p5 = por %p86_p2, %p85_p0  ;;  %p904_p6 = por %p92_p4, %p91_p3 }
   0xc   : > { %p115_p7 = scmp.eq.s32.totalorder %s882_s16, 1  ;;  %p121_p8 = scmp.eq.s32.totalorder %s693_s17, 1 }
   0xd   : > { %p695_p11 = scmp.ge.s32.totalorder %s827_s15, 2 }
   0xe   : > { %p909_p9 = por %p115_p7, %p85_p0  ;;  %p913_p10 = por %p121_p8, %p91_p3 }
   0xf   : > { %137 = sbr.rel (%p695_p11) target bundleno = 33 (0x21), region = 16 }
  0x14   : > { %s157_s26 = sand.u32 1, %s823_s14   ;;  %s711_s27 = sshll.u32 %s827_s15, 2 }
  0x15   : > { %s696_s28 = sshll.u32 %s157_s26, 3  ;;  %s166_s4 = scalar_lea.hbm %s1100_s2, %s711_s27 }
  0x16   : > { %s717_s5 = scalar_select %p900_p5, [#allocation0], [#allocation10] }
  0x17   : > { %s179_s6 = sshll.u32 %s166_s4, 4  ;;  %s161_s7 = scalar_lea.vmem [#allocation2], %s696_s28  ;;  %s180_s6 = int_to_ptr.hbm [resolvable:$true] %s179_s6 }
  0x18   : > { %s181_s8 = sshll.u32 %s161_s7, 4  ;;  %s171_s9 = sld [smem:[%s717_s5]]   ;;  %s182_s8 = int_to_ptr.vmem [resolvable:$true] %s181_s8 }
  0x19   : > { %s829_s10 = smov 128   ;;  %s830_s11 = smov 64  }
  0x1a   : > { %718 = sst [smem:[#allocation7]] (%p900_p5), %s829_s10  ;;  %s831_s17 = smov 2  }
  0x1b   : > { %719 = sst [smem:[#allocation7 + $0x1]] (%p900_p5), %s830_s11  ;;  %s832_s19 = smov 32  }
  0x1c   : > { %720 = sst [smem:[#allocation7 + $0x2]] (%p900_p5), %s831_s17  ;;  %s158_s28 = scalar_lea.sflag [#allocation3], %s157_s26 }
  0x1d   : > { %721 = sst [smem:[#allocation7 + $0x3]] (%p900_p5), %s832_s19  ;;  %s833_s29 = smov [#allocation6]  }
  0x1e   : > { %s699_s20 = sshll.u32 %s171_s9, 26  ;;  %722 = sst [smem:[#allocation7 + $0x4]] (%p900_p5), %s832_s19 }
  0x1f   : > { %s700_s27 = sadd.s32 134217728, %s699_s20  ;;  %723 = sst [smem:[#allocation7 + $0x5]] (%p900_p5), %s831_s17 }
  0x20   : > { %724 = dma.general (%p900_p5), %s180_s6, 128, %s182_s8, %s158_s28, %s833_s29, [#allocation7], %s700_s27, 0  }
  0x21 PF: > { %p701_p12 = scmp.ge.s32.totalorder %s827_s15, 1  ;;  %p202_p13 = scmp.lt.s32.totalorder %s827_s15, 3 }
  0x23   : > { %p203_p0 = pnand %p701_p12, %p202_p13 }
  0x24   : > { %s944_s30 = sand.u32 (!%p203_p0), 1, %s819_s13  }
  0x25   : > { %206 = sbr.rel (%p203_p0) target bundleno = 409 (0x199), region = 32  ;;  %s702_s4 = sshll.u32 (!%p203_p0), %s944_s30, 3 }
  0x26   : > { %s209_s5 = scalar_lea.sflag (!%p203_p0), [#allocation3], %s944_s30  ;;  %s950_s26 = scalar_lea.vmem (!%p203_p0), [#allocation2], %s702_s4 }
  0x2a   : > { %806 = dma.done.wait (%p904_p6), %s209_s5, 128  }
  0x2b   : > { %808 = vsyncadd (%p904_p6), %s209_s5, 4294967168  ;;  %vm273_vm0 = vcmask 1040896   ;;  %vm260_vm1 = vcmask 516096   ;;  %v957_v0 = vld [vmem:[%s950_s26] sm:$0x3]  ;;  %vm290_vm2 = vcmask 517121  }
  0x2c   : > { %v274_v1 = vsel %vm273_vm0, %v957_v0, -inf  ;;  %v267_v2 = vsel %vm260_vm1, %v957_v0, inf  ;;  %v261_v3 = vsel %vm260_vm1, %v957_v0, -inf  ;;  %v966_v4 = vld [vmem:[%s950_s26 + $0x2] sm:$0x3]  ;;  %v291_v8 = vsel %vm290_vm2, %v957_v0, -inf }
  0x2d   : > { %275 = vmax.xlane.f32.xlu2 %v274_v1  ;;  %268 = vmin.xlane.f32.xlu1 %v267_v2  ;;  %v277_v5 = vsel %vm273_vm0, %v966_v4, -inf  ;;  %v270_v6 = vsel %vm260_vm1, %v966_v4, inf  ;;  %v264_v7 = vsel %vm260_vm1, %v966_v4, -inf  ;;  %v283_v9 = vsel %vm273_vm0, %v966_v4, inf  ;;  %v993_v17 = vld [vmem:[%s950_s26 + $0x6] sm:$0x3] }
  0x2e   : > { %262 = vmax.xlane.f32.xlu0 %v261_v3  ;;  %v280_v10 = vsel %vm273_vm0, %v957_v0, inf  ;;  %v300_v11 = vsel %vm290_vm2, %v966_v4, inf  ;;  %v297_v12 = vsel %vm290_vm2, %v957_v0, inf  ;;  %v294_v13 = vsel %vm290_vm2, %v966_v4, -inf  ;;  %v996_v18 = vld [vmem:[%s950_s26 + $0x4] sm:$0x3] }
  0x2f   : > { %vm319_vm3 = vcmask 1041921   ;;  %v351_v19 = vsel %vm260_vm1, %v993_v17, -inf  ;;  %v348_v20 = vsel %vm260_vm1, %v996_v18, -inf  ;;  %v364_v22 = vsel %vm273_vm0, %v996_v18, -inf  ;;  %s704_s22 = sshll.u32 %s882_s16, 1  ;;  %s243_s19 = scalar_lea.vmem [#allocation5], %s702_s4 }
  0x30   : > { %v326_v14 = vsel %vm319_vm3, %v957_v0, inf  ;;  %v323_v15 = vsel %vm319_vm3, %v966_v4, -inf  ;;  %v320_v16 = vsel %vm319_vm3, %v957_v0, -inf  ;;  %v329_v21 = vsel %vm319_vm3, %v966_v4, inf  ;;  %p245_p1 = scmp.lt.s32.totalorder %s704_s22, 3  ;;  %s564_s20 = scalar_lea.sflag [#allocation4], %s944_s30 }
  0x31   : > { %v357_v23 = vsel %vm260_vm1, %v993_v17, inf  ;;  %v354_v24 = vsel %vm260_vm1, %v996_v18, inf  ;;  %v373_v25 = vsel %vm273_vm0, %v993_v17, inf  ;;  %v370_v26 = vsel %vm273_vm0, %v996_v18, inf }
  0x32   : > { %v367_v27 = vsel %vm273_vm0, %v993_v17, -inf  ;;  %v386_v28 = vsel %vm290_vm2, %v996_v18, inf  ;;  %v383_v29 = vsel %vm290_vm2, %v993_v17, -inf  ;;  %v380_v30 = vsel %vm290_vm2, %v996_v18, -inf  ;;  %s1111_s22 = smov (!%p245_p1, %s704_s22), 3 }
  0x33   : > { %v411_v31 = vsel %vm319_vm3, %v993_v17, -inf  ;;  %v408_v32 = vsel %vm319_vm3, %v996_v18, -inf  ;;  %v389_v33 = vsel %vm290_vm2, %v993_v17, inf  ;;  %vm440_vm4 = vcmask 1041408   ;;  %s247_s7 = scalar_lea.vmem %s1098_s0, %s1111_s22  ;;  %s252_s10 = scalar_lea.vmem %s1099_s1, %s1111_s22 }
  0x34   : > { %v441_v34 = vsel %vm440_vm4, %v957_v0, 0.0  ;;  %v417_v35 = vsel %vm319_vm3, %v993_v17, inf  ;;  %v414_v36 = vsel %vm319_vm3, %v996_v18, inf  ;;  %v450_v37 = vsel %vm440_vm4, %v993_v17, 0.0 }
  0x35   : > { %278 = vmax.xlane.f32.xlu2 %v277_v5  ;;  %271 = vmin.xlane.f32.xlu1 %v270_v6  ;;  %v447_v38 = vsel %vm440_vm4, %v996_v18, 0.0  ;;  %v444_v39 = vsel %vm440_vm4, %v966_v4, 0.0 }
  0x36   : > { %265 = vmax.xlane.f32.xlu0 %v264_v7 }
  0x3d   : > { %292 = vmax.xlane.f32.xlu2 %v291_v8  ;;  %284 = vmin.xlane.f32.xlu1 %v283_v9 }
  0x3e   : > { %281 = vmin.xlane.f32.xlu0 %v280_v10 }
  0x45   : > { %301 = vmin.xlane.f32.xlu2 %v300_v11  ;;  %298 = vmin.xlane.f32.xlu1 %v297_v12 }
  0x46   : > { %295 = vmax.xlane.f32.xlu0 %v294_v13 }
  0x4d   : > { %327 = vmin.xlane.f32.xlu2 %v326_v14  ;;  %324 = vmax.xlane.f32.xlu1 %v323_v15 }
  0x4e   : > { %321 = vmax.xlane.f32.xlu0 %v320_v16 }
  0x55   : > { %352 = vmax.xlane.f32.xlu2 %v351_v19  ;;  %349 = vmax.xlane.f32.xlu1 %v348_v20 }
  0x56   : > { %330 = vmin.xlane.f32.xlu0 %v329_v21 }
  0x5d   : > { %365 = vmax.xlane.f32.xlu2 %v364_v22  ;;  %358 = vmin.xlane.f32.xlu1 %v357_v23 }
  0x5e   : > { %355 = vmin.xlane.f32.xlu0 %v354_v24 }
  0x65   : > { %374 = vmin.xlane.f32.xlu2 %v373_v25  ;;  %371 = vmin.xlane.f32.xlu1 %v370_v26 }
  0x66   : > { %368 = vmax.xlane.f32.xlu0 %v367_v27 }
  0x6d   : > { %387 = vmin.xlane.f32.xlu2 %v386_v28  ;;  %384 = vmax.xlane.f32.xlu1 %v383_v29 }
  0x6e   : > { %381 = vmax.xlane.f32.xlu0 %v380_v30 }
  0x75   : > { %412 = vmax.xlane.f32.xlu2 %v411_v31  ;;  %409 = vmax.xlane.f32.xlu1 %v408_v32 }
  0x76   : > { %390 = vmin.xlane.f32.xlu0 %v389_v33 }
  0x7d   : > { %442 = vadd.xlane.f32.xlu2 %v441_v34  ;;  %418 = vmin.xlane.f32.xlu1 %v417_v35 }
  0x7e   : > { %415 = vmin.xlane.f32.xlu0 %v414_v36 }
  0x85   : > { %451 = vadd.xlane.f32.xlu2 %v450_v37  ;;  %448 = vadd.xlane.f32.xlu1 %v447_v38 }
  0x86   : > { %445 = vadd.xlane.f32.xlu0 %v444_v39 }
  0xa0   : > { %v276_v40 = vpop.xlane.xlu2 %275  ;;  %v269_v41 = vpop.xlane.xlu1 %268 }
  0xa1   : > { %v263_v42 = vpop.xlane.xlu0 %262 }
  0xa2   : > { %v286_v43 = vadd.f32 %v276_v40, %v263_v42 }
  0xa8   : > { %v279_v44 = vpop.xlane.xlu2 %278  ;;  %v272_v45 = vpop.xlane.xlu1 %271 }
  0xa9   : > { %v266_v46 = vpop.xlane.xlu0 %265 }
  0xaa   : > { %v287_v10 = vadd.f32 %v279_v44, %v266_v46 }
  0xb0   : > { %v293_v47 = vpop.xlane.xlu2 %292  ;;  %v285_v48 = vpop.xlane.xlu1 %284 }
  0xb1   : > { %v282_v49 = vpop.xlane.xlu0 %281  ;;  %v305_v7 = vrot.slane %v293_v47, 1  ;;  %v289_v11 = vadd.f32 %v285_v48, %v272_v45 }
  0xb2   : > { %v288_v13 = vadd.f32 %v282_v49, %v269_v41 }
  0xb3   : > { %v309_v20 = vadd.f32 %v305_v7, %v286_v43 }
  0xb8   : > { %v302_v50 = vpop.xlane.xlu2 %301  ;;  %v299_v51 = vpop.xlane.xlu1 %298 }
  0xb9   : > { %v296_v52 = vpop.xlane.xlu0 %295  ;;  %v314_v8 = vrot.slane %v302_v50, 1  ;;  %v313_v9 = vrot.slane %v299_v51, 1 }
  0xba   : > { %v306_v6 = vrot.slane %v296_v52, 1 }
  0xbb   : > { %v318_v21 = vadd.f32 %v314_v8, %v289_v11  ;;  %v317_v22 = vadd.f32 %v313_v9, %v288_v13 }
  0xbc   : > { %v310_v19 = vadd.f32 %v306_v6, %v287_v10 }
  0xc0   : > { %v328_v53 = vpop.xlane.xlu2 %327  ;;  %v325_v54 = vpop.xlane.xlu1 %324 }
  0xc1   : > { %v322_v55 = vpop.xlane.xlu0 %321  ;;  %v335_v12 = vrot.slane %v325_v54, 1  ;;  %v342_v14 = vrot.slane %v328_v53, 1 }
  0xc2   : > { %v334_v15 = vrot.slane %v322_v55, 1 }
  0xc3   : > { %v339_v25 = vadd.f32 %v335_v12, %v310_v19  ;;  %v346_v29 = vadd.f32 %v342_v14, %v317_v22 }
  0xc4   : > { %v338_v27 = vadd.f32 %v334_v15, %v309_v20 }
  0xc8   : > { %v353_v56 = vpop.xlane.xlu2 %352  ;;  %v350_v57 = vpop.xlane.xlu1 %349 }
  0xc9   : > { %v331_v58 = vpop.xlane.xlu0 %330  ;;  %v361_v30 = vadd.f32 %v353_v56, %v339_v25  ;;  %v360_v32 = vadd.f32 %v350_v57, %v338_v27  ;;  %v834_v57 = vmov 0  }
  0xca   : > { %v343_v16 = vrot.slane %v331_v58, 1  ;;  %784 = vset.pattern.permute.xlu1 %v834_v57  ;;  %783 = vset.pattern.permute.xlu0 %v834_v57 }
  0xcc   : > { %v347_v28 = vadd.f32 %v343_v16, %v318_v21 }
  0xd0   : > { %v366_v59 = vpop.xlane.xlu2 %365  ;;  %v359_v60 = vpop.xlane.xlu1 %358 }
  0xd1   : > { %v356_v61 = vpop.xlane.xlu0 %355  ;;  %v363_v33 = vadd.f32 %v359_v60, %v347_v28  ;;  %v376_v40 = vadd.f32 %v366_v59, %v360_v32 }
  0xd2   : > { %v362_v34 = vadd.f32 %v356_v61, %v346_v29 }
  0xd8   : > { %v375_v62 = vpop.xlane.xlu2 %374  ;;  %v372_v63 = vpop.xlane.xlu1 %371 }
  0xd9   : > { %v369_v1 = vpop.xlane.xlu0 %368  ;;  %v379_v42 = vadd.f32 %v375_v62, %v363_v33  ;;  %v378_v43 = vadd.f32 %v372_v63, %v362_v34 }
  0xda   : > { %v377_v36 = vadd.f32 %v369_v1, %v361_v30 }
  0xe0   : > { %v388_v2 = vpop.xlane.xlu2 %387  ;;  %v385_v3 = vpop.xlane.xlu1 %384 }
  0xe1   : > { %v382_v5 = vpop.xlane.xlu0 %381  ;;  %v395_v31 = vrot.slane %v385_v3, 1  ;;  %v402_v37 = vrot.slane %v388_v2, 1 }
  0xe2   : > { %v394_v35 = vrot.slane %v382_v5, 1 }
  0xe3   : > { %v399_v44 = vadd.f32 %v395_v31, %v377_v36  ;;  %v406_v48 = vadd.f32 %v402_v37, %v378_v43 }
  0xe4   : > { %v398_v45 = vadd.f32 %v394_v35, %v376_v40 }
  0xe8   : > { %v413_v23 = vpop.xlane.xlu2 %412  ;;  %v410_v24 = vpop.xlane.xlu1 %409 }
  0xe9   : > { %v391_v26 = vpop.xlane.xlu0 %390  ;;  %v423_v38 = vrot.slane %v413_v23, 1  ;;  %v422_v41 = vrot.slane %v410_v24, 1 }
  0xea   : > { %v403_v39 = vrot.slane %v391_v26, 1 }
  0xeb   : > { %v427_v49 = vadd.f32 %v423_v38, %v399_v44  ;;  %v426_v53 = vadd.f32 %v422_v41, %v398_v45 }
  0xec   : > { %v407_v50 = vadd.f32 %v403_v39, %v379_v42 }
  0xed   : > { %v437_v59 = vmul.f32 0.125, %v427_v49  ;;  %v436_v62 = vmul.f32 0.125, %v426_v53 }
  0xf0   : > { %v443_v46 = vpop.xlane.xlu2 %442  ;;  %v419_v47 = vpop.xlane.xlu1 %418 }
  0xf1   : > { %v431_v51 = vrot.slane %v419_v47, 1  ;;  %v416_v52 = vpop.xlane.xlu0 %415  ;;  %v453_v54 = vsel %vm440_vm4, %v443_v46, 0.0 }
  0xf2   : > { %v430_v55 = vrot.slane %v416_v52, 1  ;;  %v454_v60 = vrot.slane %v453_v54, 4 }
  0xf3   : > { %v435_v56 = vadd.f32 %v431_v51, %v407_v50 }
  0xf4   : > { %v434_v58 = vadd.f32 %v430_v55, %v406_v48  ;;  %v455_v6 = vadd.f32 %v454_v60, %v453_v54 }
  0xf5   : > { %v439_v61 = vmul.f32 0.125, %v435_v56  ;;  %v522_v56 = vld [vmem:[%s247_s7 + $0x1] sm:$0x1] }
  0xf6   : > { %v438_v63 = vmul.f32 0.125, %v434_v58  ;;  %v456_v21 = vrot.slane %v455_v6, 2  ;;  %v521_v58 = vld [vmem:[%s247_s7] sm:$0x1] }
  0xf7   : > { %v486_v1 = vsub.f32 %v437_v59, %v439_v61 }
  0xf8   : > { %v485_v2 = vsub.f32 %v436_v62, %v438_v63  ;;  %v452_v3 = vpop.xlane.xlu2 %451  ;;  %v449_v5 = vpop.xlane.xlu1 %448  ;;  %v457_v28 = vadd.f32 %v456_v21, %v455_v6 }
  0xf9   : > { %v488_v7 = vmul.f32 0.34673417, %v486_v1  ;;  %v474_v8 = vsel %vm440_vm4, %v452_v3, 0.0  ;;  %v467_v9 = vsel %vm440_vm4, %v449_v5, 0.0  ;;  %v446_v10 = vpop.xlane.xlu0 %445  ;;  %v526_v5 = vld [vmem:[%s252_s10 + $0x1] sm:$0x1] }
  0xfa   : > { %v487_v11 = vmul.f32 0.34673417, %v485_v2  ;;  %v475_v12 = vrot.slane %v474_v8, 4  ;;  %v468_v13 = vrot.slane %v467_v9, 4  ;;  %v460_v15 = vsel %vm440_vm4, %v446_v10, 0.0 }
  0xfb   : > { %v490_v14 = vadd.f32 1e-05, %v488_v7  ;;  %v461_v22 = vrot.slane %v460_v15, 4  ;;  %v458_v36 = vrot.slane %v457_v28, 1  ;;  %v525_v7 = vld [vmem:[%s252_s10] sm:$0x1] }
  0xfc   : > { %v489_v16 = vadd.f32 1e-05, %v487_v11  ;;  %v476_v19 = vadd.f32 %v475_v12, %v474_v8  ;;  %v469_v20 = vadd.f32 %v468_v13, %v467_v9 }
  0xfd   : > { %785 = vrcp.f32 %v490_v14  ;;  %v462_v25 = vadd.f32 %v461_v22, %v460_v15  ;;  %v517_v44 = vand.u32 2147483648, %v490_v14  ;;  %v515_v47 = vand.u32 2147483647, %v490_v14 }
  0xfe   : > { %787 = vrcp.f32 %v489_v16  ;;  %v477_v23 = vrot.slane %v476_v19, 2  ;;  %v470_v24 = vrot.slane %v469_v20, 2  ;;  %v502_v45 = vand.u32 2147483648, %v489_v16 }
  0xff   : > { %v463_v29 = vrot.slane %v462_v25, 2  ;;  %v459_v48 = vadd.f32 %v458_v36, %v457_v28  ;;  %v500_v50 = vand.u32 2147483647, %v489_v16  ;;  %vm511_vm7 = vweird.f32 %v490_v14 }
 0x100   : > { %v478_v26 = vadd.f32 %v477_v23, %v476_v19  ;;  %v471_v27 = vadd.f32 %v470_v24, %v469_v20  ;;  %vm496_vm8 = vweird.f32 %v489_v16  ;;  %v518_v55 = vor.u32 1.1754944e-38, %v517_v44 }
 0x101   : > { %v464_v33 = vadd.f32 %v463_v29, %v462_v25  ;;  %v503_v57 = vor.u32 1.1754944e-38, %v502_v45  ;;  %vm516_vm11 = vcmp.eq.f32.partialorder %v515_v47, 8.507059e+37  ;;  %vm501_vm12 = vcmp.eq.f32.partialorder %v500_v50, 8.507059e+37 }
 0x102   : > { %v479_v30 = vrot.slane %v478_v26, 1  ;;  %v472_v32 = vrot.slane %v471_v27, 1 }
 0x103   : > { %v786_v31 = vpop.eup %785  ;;  %v465_v37 = vrot.slane %v464_v33, 1 }
 0x104   : > { %v788_v34 = vpop.eup %787  ;;  %v507_v35 = vmul.f32 %v786_v31, %v490_v14  ;;  %v480_v39 = vadd.f32 %v479_v30, %v478_v26  ;;  %v473_v41 = vadd.f32 %v472_v32, %v471_v27  ;;  %vm512_vm5 = vweird.f32 %v786_v31 }
 0x105   : > { %v492_v38 = vmul.f32 %v788_v34, %v489_v16  ;;  %v466_v42 = vadd.f32 %v465_v37, %v464_v33  ;;  %vm497_vm6 = vweird.f32 %v788_v34  ;;  %vm513_vm9 = vmor %vm511_vm7, %vm512_vm5 }
 0x106   : > { %v508_v40 = vsub.f32 1.0, %v507_v35  ;;  %v481_v53 = vadd.f32 %v473_v41, %v459_v48  ;;  %vm498_vm10 = vmor %vm496_vm8, %vm497_vm6 }
 0x107   : > { %v493_v43 = vsub.f32 1.0, %v492_v38  ;;  %v482_v51 = vadd.f32 %v480_v39, %v466_v42 }
 0x108   : > { %v509_v46 = vmul.f32 %v786_v31, %v508_v40  ;;  %v483_v2 = vmul.f32 0.001953125, %v481_v53 }
 0x109   : > { %v494_v49 = vmul.f32 %v788_v34, %v493_v43  ;;  %v484_v63 = vmul.f32 0.001953125, %v482_v51 }
 0x10a   : > { %v510_v52 = vadd.f32 %v786_v31, %v509_v46 }
 0x10b   : > { %v495_v54 = vadd.f32 %v788_v34, %v494_v49 }
 0x10c   : > { %v514_v59 = vsel %vm513_vm9, %v786_v31, %v510_v52 }
 0x10d   : > { %v499_v60 = vsel %vm498_vm10, %v788_v34, %v495_v54  ;;  %v519_v61 = vsel %vm516_vm11, %v518_v55, %v514_v59 }
 0x10e   : > { %v504_v62 = vsel %vm501_vm12, %v503_v57, %v499_v60  ;;  %v524_v1 = vmul.f32 %v522_v56, %v519_v61 }
 0x10f   : > { %v523_v3 = vmul.f32 %v521_v58, %v504_v62 }
 0x110   : > { %v528_v6 = vmul.f32 %v524_v1, %v484_v63 }
 0x111   : > { %v527_v8 = vmul.f32 %v523_v3, %v483_v2  ;;  %713 = vpush %v523_v3 }
 0x112   : > { %715 = vpush %v524_v1  ;;  %v530_v9 = vsub.f32 %v526_v5, %v528_v6 }
 0x113   : > { %v529_v10 = vsub.f32 %v525_v7, %v527_v8 }
 0x114   : > { %v546_v11 = vperm.slane %v530_v9, 0 }
 0x115   : > { %v545_v12 = vperm.slane %v529_v10, 0 }
 0x116   : > { %552 = vperm.xlu1 %784, %v546_v11  }
 0x117   : > { %548 = vperm.xlu0 %783, %v545_v12  }
 0x142   : > { %s714_s11 = spop %713 }
 0x143   : > { %s716_s17 = spop %715  ;;  %v533_v14 = vstv %s714_s11 }
 0x144   : > { %v537_v13 = vstv %s716_s17  ;;  %v539_v19 = vmul.f32 %v533_v14, %v957_v0  ;;  %v541_v20 = vmul.f32 %v533_v14, %v996_v18 }
 0x145   : > { %v540_v15 = vmul.f32 %v537_v13, %v966_v4  ;;  %v542_v16 = vmul.f32 %v537_v13, %v993_v17 }
 0x188   : > { %v553_v21 = vpop.permute.xlu1 %552 }
 0x189   : > { %v556_v22 = vadd.f32 %v553_v21, %v540_v15  ;;  %v558_v23 = vadd.f32 %v553_v21, %v542_v16  ;;  %v549_v24 = vpop.permute.xlu0 %548 }
 0x18a   : > { %v555_v25 = vadd.f32 %v549_v24, %v539_v19  ;;  %v557_v26 = vadd.f32 %v549_v24, %v541_v20 }
 0x18b   : > { %560 = vst [vmem:[%s243_s19 + $0x2] sm:$0x3] %v556_v22 }
 0x18c   : > { %562 = vst [vmem:[%s243_s19 + $0x6] sm:$0x3] %v558_v23 }
 0x18d   : > { %559 = vst [vmem:[%s243_s19] sm:$0x3] %v555_v25 }
 0x18e   : > { %561 = vst [vmem:[%s243_s19 + $0x4] sm:$0x3] %v557_v26 }
 0x18f   : > { %s712_s27 = sshll.u32 %s882_s16, 2  ;;  %s586_s28 = sshll.u32 %s243_s19, 4  ;;  %s587_s28 = int_to_ptr.vmem [resolvable:$true] %s586_s28 }
 0x190   : > { %s575_s26 = scalar_lea.hbm %s1101_s3, %s712_s27  ;;  %s835_s22 = smov 64  }
 0x191   : > { %s588_s4 = sshll.u32 %s575_s26, 4  ;;  %726 = sst [smem:[#allocation9]] (%p909_p9), %s835_s22  ;;  %s589_s4 = int_to_ptr.hbm [resolvable:$true] %s588_s4 }
 0x192   : > { %s836_s30 = smov 128   ;;  %s837_s23 = smov 2  }
 0x193   : > { %727 = sst [smem:[#allocation9 + $0x1]] (%p909_p9), %s836_s30  ;;  %s838_s6 = smov 32  }
 0x194   : > { %728 = sst [smem:[#allocation9 + $0x2]] (%p909_p9), %s837_s23  ;;  %s839_s16 = smov [#allocation8]  }
 0x195   : > { %729 = sst [smem:[#allocation9 + $0x3]] (%p909_p9), %s838_s6  ;;  %s840_s7 = smov 0  }
 0x196   : > { %730 = sst [smem:[#allocation9 + $0x4]] (%p909_p9), %s838_s6 }
 0x197   : > { %731 = sst [smem:[#allocation9 + $0x5]] (%p909_p9), %s837_s23 }
 0x198   : > { %732 = dma.general (%p909_p9), %s587_s28, 128, %s589_s4, %s564_s20, %s839_s16, [#allocation9], %s840_s7, 0  }
 0x199 PF: > { %s616_s8 = sand.u32 1, %s815_s12   ;;  %p735_p2 = pnand %p695_p11, %p913_p10 }
 0x19a   : > { %s617_s9 = scalar_lea.sflag [#allocation4], %s616_s8 }
 0x19b   : > { %p736_p3 = pneg %p735_p2 }
 0x19d   : > { %810 = dma.done.wait (%p736_p3), %s617_s9, 128  }
 0x19e   : > { %812 = vsyncadd (%p736_p3), %s617_s9, 4294967168  ;;  %p16_p4 = scmp.ge.s32.totalorder %s886_s18, 4   ;;  %s1106_s12 = smov %s819_s13 }
 0x19f   : > { %s1107_s13 = smov %s823_s14  ;;  %s1108_s14 = smov %s898_s21 }
 0x1a0   : > { %s1109_s15 = smov %s886_s18  ;;  %18 = sbr.rel (!%p16_p4) target bundleno = 5 (0x5), region = 93 }
 0x1a5   :  { %623 = vsyncpa [#allocation3], 1 }
 0x1a6   :  { %625 = vsyncpa [#allocation3 + $0x1], 1 }
 0x1a7   :  { %626 = vsyncpa [#allocation4], 1 }
 0x1a8   :  { %628 = vsyncpa [#allocation4 + $0x1], 1 }

</bundles_post_ra>
